<compile_context>
chip_gen: v7x
topology: tpu7x:2x2x1
jax: 0.10.0
libtpu: 0.0.40
codegen_flags: <defaults>
</compile_context>

<pallas_src>
import functools

import jax
import jax.numpy as jnp
from jax import lax
from jax.experimental import pallas as pl
from jax.experimental.pallas import tpu as pltpu

EPS = 1e-5


def _layer_stats_kernel(x_ref, w_ref, b_ref, y_ref, colsum_ref, colsq_ref):
    """One row tile of y = tanh(x @ W_t + b), plus per-tile column sum / sum-of-squares
    of y (partial BatchNorm statistics for the *next* layer). Any BN affine acting on x
    has already been folded into (W_t, b) by the caller, so x enters the MXU in its
    native dtype (bf16 stays bf16 -- no hidden f32 multi-pass matmul)."""
    y = jnp.dot(x_ref[...], w_ref[...], preferred_element_type=jnp.float32) + b_ref[...]
    y = jnp.tanh(y)
    y_ref[...] = y.astype(y_ref.dtype)
    # Fused one-pass statistics (sum, sum of squares): tanh output is bounded in
    # [-1, 1], so E[y^2] - E[y]^2 in f32 is numerically safe.
    colsum_ref[...] = jnp.sum(y, axis=0, keepdims=True)[None]
    colsq_ref[...] = jnp.sum(y * y, axis=0, keepdims=True)[None]


def _layer_kernel(x_ref, w_ref, b_ref, y_ref):
    """Stats-free variant for the last layer (its output feeds no BatchNorm)."""
    y = jnp.dot(x_ref[...], w_ref[...], preferred_element_type=jnp.float32) + b_ref[...]
    y_ref[...] = jnp.tanh(y).astype(y_ref.dtype)


def _fused_layer(h, w_t, b, *, block_rows, emit_stats):
    """Row-tiled (Linear + Tanh [+ BN partial stats]) pallas_call.

    The (D, D) weight and (1, D) bias are resident VMEM operands (index_map -> block 0
    every step); the N = B*S row dimension is tiled and double-buffered by the Pallas
    pipeline, so HBM activation traffic overlaps compute."""
    n, d = h.shape
    num_tiles = n // block_rows

    row_spec = pl.BlockSpec((block_rows, d), lambda t: (t, 0))
    vec_spec = pl.BlockSpec((1, d), lambda t: (0, 0))       # resident bias
    w_spec = pl.BlockSpec((d, d), lambda t: (0, 0))         # resident weights
    stat_spec = pl.BlockSpec((1, 1, d), lambda t: (t, 0, 0))

    act_bytes = jnp.dtype(h.dtype).itemsize
    cost = pl.CostEstimate(
        flops=2 * n * d * d + (4 if emit_stats else 2) * n * d,
        transcendentals=n * d,
        bytes_accessed=2 * n * d * act_bytes
        + d * d * jnp.dtype(w_t.dtype).itemsize
        + d * 4
        + (2 * num_tiles * d * 4 if emit_stats else 0),
    )

    if emit_stats:
        kernel = _layer_stats_kernel
        out_specs = (row_spec, stat_spec, stat_spec)
        out_shape = (
            jax.ShapeDtypeStruct((n, d), h.dtype),
            jax.ShapeDtypeStruct((num_tiles, 1, d), jnp.float32),
            jax.ShapeDtypeStruct((num_tiles, 1, d), jnp.float32),
        )
    else:
        kernel = _layer_kernel
        out_specs = row_spec
        out_shape = jax.ShapeDtypeStruct((n, d), h.dtype)

    return pl.pallas_call(
        kernel,
        grid=(num_tiles,),
        in_specs=[row_spec, w_spec, vec_spec],
        out_specs=out_specs,
        out_shape=out_shape,
        compiler_params=pltpu.CompilerParams(
            # Independent row tiles -> megacore can split the grid on v7x.
            dimension_semantics=("parallel",),
        ),
        cost_estimate=cost,
    )(h, w_t, b)


def _fold_bn_into_linear(colsum, colsq, gamma, beta, w_t, b, n_rows):
    """Combine per-tile partial stats into the train-mode BatchNorm1d affine and fold
    it into the NEXT Linear layer:  (y*scale + shift) @ W_t + b
                                  =  y @ (scale[:,None]*W_t) + (shift @ W_t + b).
    Biased variance, eps=1e-5 (PyTorch defaults). Returns (w_folded, b_folded)."""
    # TODO(synk): running_mean/running_var momentum buffer updates (training-time side
    # effect) are not emitted; the forward output only needs batch statistics.
    s1 = jnp.sum(colsum, axis=(0, 1))                       # (D,)
    s2 = jnp.sum(colsq, axis=(0, 1))                        # (D,)
    mean = s1 / n_rows
    var = jnp.maximum(s2 / n_rows - mean * mean, 0.0)       # one-pass variance (f32)
    inv = lax.rsqrt(var + EPS)
    scale = gamma.reshape(-1).astype(jnp.float32) * inv             # (D,)
    shift = beta.reshape(-1).astype(jnp.float32) - mean * scale     # (D,)
    w_f32 = w_t.astype(jnp.float32)
    # Cast folded weights back to the weight dtype so the MXU sees matched native
    # operands (tiny requantization error if weights are bf16); bias stays f32 --
    # it is added to the f32 accumulator anyway.
    w_folded = (scale[:, None] * w_f32).astype(w_t.dtype)
    b_folded = shift[None, :] @ w_f32 + b.astype(jnp.float32)       # (1, D)
    return w_folded, b_folded


def _pick_block_rows(n, max_rows=2048):
    """Largest sublane-aligned divisor of n up to max_rows (falls back to full n)."""
    cand = (min(max_rows, n) // 8) * 8
    while cand >= 8:
        if n % cand == 0:
            return cand
        cand -= 8
    return n


def mlp3_pallas(x, params, block_rows=None):
    """x: (B, S, D). Matches MLP3.forward with batch_norm_dim='1d' (train-mode BN).
    For production, cast x (and init weights) to bf16: activations then stay bf16
    end-to-end while stats / accumulation / bias remain f32."""
    b_, s_, d = x.shape
    n = b_ * s_
    h = x.reshape(n, d)

    if block_rows is None:
        block_rows = _pick_block_rows(n)
    # TODO(synk): non-divisible N hard-fails instead of padding/masking the last tile.
    assert n % block_rows == 0, "N = B*S must be divisible by block_rows"
    assert block_rows % 8 == 0 or block_rows == n, "row tile must be sublane (8) aligned"
    # TODO(synk): for D not a multiple of 128 the output stores are lane-masked; pad the
    # feature dim (zero weight columns) if that case ever becomes performance-critical.

    # l1 + t1 (+ partial stats for b1)
    h1, cs1, cq1 = _fused_layer(h, params["w1_t"], params["b1"],
                                block_rows=block_rows, emit_stats=True)
    # b1 folded into l2's weights/bias (tiny O(D^2) combine in plain JAX)
    w2f, b2f = _fold_bn_into_linear(cs1, cq1, params["g1"], params["be1"],
                                    params["w2_t"], params["b2"], n)
    # (b1+)l2 + t2 (+ partial stats for b2)
    h2, cs2, cq2 = _fused_layer(h1, w2f, b2f, block_rows=block_rows, emit_stats=True)
    w3f, b3f = _fold_bn_into_linear(cs2, cq2, params["g2"], params["be2"],
                                    params["w3_t"], params["b3"], n)
    # (b2+)l3 + t3 -- stats-free variant
    out = _fused_layer(h2, w3f, b3f, block_rows=block_rows, emit_stats=False)
    return out.reshape(b_, s_, d)


def init_params(key, d_model, dtype=jnp.float32):
    """Deterministic synthetic parameters matching nn.Linear / nn.BatchNorm1d shapes.
    Weights stored as W^T in `dtype` (use bf16 for production); biases / BN params f32."""
    ks = jax.random.split(key, 6)
    bound = 1.0 / jnp.sqrt(d_model)

    def lin(kw, kb):
        w = jax.random.uniform(kw, (d_model, d_model), jnp.float32, -bound, bound)
        b = jax.random.uniform(kb, (1, d_model), jnp.float32, -bound, bound)
        return w.T.astype(dtype), b                      # kernels do h @ w_t + b

    w1_t, b1 = lin(ks[0], ks[1])
    w2_t, b2 = lin(ks[2], ks[3])
    w3_t, b3 = lin(ks[4], ks[5])
    ones = jnp.ones((d_model,), jnp.float32)
    zeros = jnp.zeros((d_model,), jnp.float32)
    return dict(w1_t=w1_t, b1=b1, g1=ones, be1=zeros,
                w2_t=w2_t, b2=b2, g2=ones, be2=zeros,
                w3_t=w3_t, b3=b3)


def mlp3_ref(x, p):
    """Pure-JAX reference of the PyTorch forward (train-mode BN, centered variance)."""
    b_, s_, d = x.shape
    h = x.reshape(b_ * s_, d).astype(jnp.float32)

    def bn(h, g, be):
        m = h.mean(0, keepdims=True)
        v = ((h - m) ** 2).mean(0, keepdims=True)
        return g[None, :] * (h - m) / jnp.sqrt(v + EPS) + be[None, :]

    h = jnp.tanh(h @ p["w1_t"].astype(jnp.float32) + p["b1"])
    h = bn(h, p["g1"], p["be1"])
    h = jnp.tanh(h @ p["w2_t"].astype(jnp.float32) + p["b2"])
    h = bn(h, p["g2"], p["be2"])
    h = jnp.tanh(h @ p["w3_t"].astype(jnp.float32) + p["b3"])
    return h.reshape(b_, s_, d)


if __name__ == "__main__":
    key = jax.random.PRNGKey(0)
    kx, kp = jax.random.split(key)

    B, S, D = 2, 8, 128  # d_model = 128 keeps the feature (lane) dim dense
    x = jax.random.normal(kx, (B, S, D), jnp.float32)
    params = init_params(kp, D)

    # block_rows=8 -> 2 row tiles per call: exercises the tiled grid, the partial-stat
    # combine, and gives megacore an even split. Production uses the 2048-cap default.
    fwd = jax.jit(functools.partial(mlp3_pallas, block_rows=8))
    out = jax.block_until_ready(fwd(x, params))

    ref = mlp3_ref(x, params)
    assert out.shape == (B, S, D)
    # Folded-affine + one-pass variance + MXU accumulation order differ slightly from
    # the straight-line reference, hence the (still tight) tolerance.
    assert jnp.allclose(out, ref, atol=1e-4, rtol=1e-4), float(jnp.abs(out - ref).max())

    print("KERNEL_OK")
</pallas_src>

<mosaic_0001>
module attributes {stable_mosaic.version = 11 : i64} {
  func.func @_layer_stats_kernel(%arg0: i32, %arg1: memref<8x128xf32, #tpu.memory_space<vmem>>, %arg2: memref<128x128xf32, #tpu.memory_space<vmem>>, %arg3: memref<1x128xf32, #tpu.memory_space<vmem>>, %arg4: memref<8x128xf32, #tpu.memory_space<vmem>>, %arg5: memref<1x1x128xf32, #tpu.memory_space<vmem>>, %arg6: memref<1x1x128xf32, #tpu.memory_space<vmem>>) attributes {dimension_semantics = [#tpu.dimension_semantics<parallel>], iteration_bounds = array<i64: 2>, scalar_prefetch = 0 : i64, scratch_operands = 0 : i64, tpu.core_type = #tpu.core_type<tc>, window_params = [{transform_indices = @transform_0, window_bounds = array<i64: 8, 128>}, {pipeline_mode = #tpu.pipeline_mode<synchronous>, transform_indices = @transform_1, window_bounds = array<i64: 128, 128>}, {pipeline_mode = #tpu.pipeline_mode<synchronous>, transform_indices = @transform_2, window_bounds = array<i64: 1, 128>}, {transform_indices = @transform_3, window_bounds = array<i64: 8, 128>}, {transform_indices = @transform_4, window_bounds = array<i64: 1, 1, 128>}, {transform_indices = @transform_5, window_bounds = array<i64: 1, 1, 128>}]} {
    %c0 = arith.constant 0 : index
    %c0_0 = arith.constant 0 : index
    %0 = vector.load %arg1[%c0, %c0_0] : memref<8x128xf32, #tpu.memory_space<vmem>>, vector<8x128xf32>
    %c0_1 = arith.constant 0 : index
    %c0_2 = arith.constant 0 : index
    %1 = vector.load %arg2[%c0_1, %c0_2] : memref<128x128xf32, #tpu.memory_space<vmem>>, vector<128x128xf32>
    %cst = arith.constant dense<0.000000e+00> : vector<8x128xf32>
    %2 = tpu.matmul %0, %1, %cst {dimension_numbers = #tpu.dot_dimension_numbers<[1], [0], [0], [1], [0, 0, 1, 1], [], []>} : vector<8x128xf32>, vector<128x128xf32>, vector<8x128xf32> -> vector<8x128xf32>
    %c0_3 = arith.constant 0 : index
    %c0_4 = arith.constant 0 : index
    %3 = vector.load %arg3[%c0_3, %c0_4] : memref<1x128xf32, #tpu.memory_space<vmem>>, vector<1x128xf32>
    %4 = vector.broadcast %3 : vector<1x128xf32> to vector<8x128xf32>
    %5 = arith.addf %2, %4 : vector<8x128xf32>
    %6 = math.tanh %5 : vector<8x128xf32>
    %c0_5 = arith.constant 0 : index
    %c0_6 = arith.constant 0 : index
    %7 = vector.load %arg4[%c0_5, %c0_6] : memref<8x128xf32, #tpu.memory_space<vmem>>, vector<8x128xf32>
    tpu.vector_store %arg4[%c0_5, %c0_6], %6 {strides = array<i32>} : memref<8x128xf32, #tpu.memory_space<vmem>>, vector<8x128xf32>,
    %cst_7 = arith.constant dense<0.000000e+00> : vector<128xf32>
    %8 = vector.multi_reduction <add>, %6, %cst_7 [0] : vector<8x128xf32> to vector<128xf32>
    %9 = vector.shape_cast %8 : vector<128xf32> to vector<1x128xf32>
    %10 = vector.shape_cast %9 : vector<1x128xf32> to vector<1x1x128xf32>
    %c0_8 = arith.constant 0 : index
    %c0_9 = arith.constant 0 : index
    %c0_10 = arith.constant 0 : index
    %11 = vector.load %arg5[%c0_8, %c0_9, %c0_10] : memref<1x1x128xf32, #tpu.memory_space<vmem>>, vector<1x1x128xf32>
    tpu.vector_store %arg5[%c0_8, %c0_9, %c0_10], %10 {strides = array<i32>} : memref<1x1x128xf32, #tpu.memory_space<vmem>>, vector<1x1x128xf32>,
    %12 = arith.mulf %6, %6 : vector<8x128xf32>
    %cst_11 = arith.constant dense<0.000000e+00> : vector<128xf32>
    %13 = vector.multi_reduction <add>, %12, %cst_11 [0] : vector<8x128xf32> to vector<128xf32>
    %14 = vector.shape_cast %13 : vector<128xf32> to vector<1x128xf32>
    %15 = vector.shape_cast %14 : vector<1x128xf32> to vector<1x1x128xf32>
    %c0_12 = arith.constant 0 : index
    %c0_13 = arith.constant 0 : index
    %c0_14 = arith.constant 0 : index
    %16 = vector.load %arg6[%c0_12, %c0_13, %c0_14] : memref<1x1x128xf32, #tpu.memory_space<vmem>>, vector<1x1x128xf32>
    tpu.vector_store %arg6[%c0_12, %c0_13, %c0_14], %15 {strides = array<i32>} : memref<1x1x128xf32, #tpu.memory_space<vmem>>, vector<1x1x128xf32>,
    return
  }
  func.func @transform_0(%arg0: i32) -> (i32, i32) {
    %c0_i32 = arith.constant 0 : i32
    %c0_i32_0 = arith.constant 0 : i32
    return %arg0, %c0_i32 : i32, i32
  }
  func.func @transform_1(%arg0: i32) -> (i32, i32) {
    %c0_i32 = arith.constant 0 : i32
    %c0_i32_0 = arith.constant 0 : i32
    %c0_i32_1 = arith.constant 0 : i32
    return %c0_i32, %c0_i32_0 : i32, i32
  }
  func.func @transform_2(%arg0: i32) -> (i32, i32) {
    %c0_i32 = arith.constant 0 : i32
    %c0_i32_0 = arith.constant 0 : i32
    %c0_i32_1 = arith.constant 0 : i32
    return %c0_i32, %c0_i32_0 : i32, i32
  }
  func.func @transform_3(%arg0: i32) -> (i32, i32) {
    %c0_i32 = arith.constant 0 : i32
    %c0_i32_0 = arith.constant 0 : i32
    return %arg0, %c0_i32 : i32, i32
  }
  func.func @transform_4(%arg0: i32) -> (i32, i32, i32) {
    %c0_i32 = arith.constant 0 : i32
    %c0_i32_0 = arith.constant 0 : i32
    %c0_i32_1 = arith.constant 0 : i32
    return %arg0, %c0_i32, %c0_i32_0 : i32, i32, i32
  }
  func.func @transform_5(%arg0: i32) -> (i32, i32, i32) {
    %c0_i32 = arith.constant 0 : i32
    %c0_i32_0 = arith.constant 0 : i32
    %c0_i32_1 = arith.constant 0 : i32
    return %arg0, %c0_i32, %c0_i32_0 : i32, i32, i32
  }
}

module attributes {stable_mosaic.version = 11 : i64} {
  func.func @_layer_stats_kernel(%arg0: i32, %arg1: memref<8x128xf32, #tpu.memory_space<vmem>>, %arg2: memref<128x128xf32, #tpu.memory_space<vmem>>, %arg3: memref<1x128xf32, #tpu.memory_space<vmem>>, %arg4: memref<8x128xf32, #tpu.memory_space<vmem>>, %arg5: memref<1x1x128xf32, #tpu.memory_space<vmem>>, %arg6: memref<1x1x128xf32, #tpu.memory_space<vmem>>) attributes {dimension_semantics = [#tpu.dimension_semantics<parallel>], iteration_bounds = array<i64: 2>, scalar_prefetch = 0 : i64, scratch_operands = 0 : i64, tpu.core_type = #tpu.core_type<tc>, window_params = [{transform_indices = @transform_0, window_bounds = array<i64: 8, 128>}, {pipeline_mode = #tpu.pipeline_mode<synchronous>, transform_indices = @transform_1, window_bounds = array<i64: 128, 128>}, {pipeline_mode = #tpu.pipeline_mode<synchronous>, transform_indices = @transform_2, window_bounds = array<i64: 1, 128>}, {transform_indices = @transform_3, window_bounds = array<i64: 8, 128>}, {transform_indices = @transform_4, window_bounds = array<i64: 1, 1, 128>}, {transform_indices = @transform_5, window_bounds = array<i64: 1, 1, 128>}]} {
    %c0 = arith.constant 0 : index
    %c0_0 = arith.constant 0 : index
    %0 = vector.load %arg1[%c0, %c0_0] : memref<8x128xf32, #tpu.memory_space<vmem>>, vector<8x128xf32>
    %c0_1 = arith.constant 0 : index
    %c0_2 = arith.constant 0 : index
    %1 = vector.load %arg2[%c0_1, %c0_2] : memref<128x128xf32, #tpu.memory_space<vmem>>, vector<128x128xf32>
    %cst = arith.constant dense<0.000000e+00> : vector<8x128xf32>
    %2 = tpu.matmul %0, %1, %cst {dimension_numbers = #tpu.dot_dimension_numbers<[1], [0], [0], [1], [0, 0, 1, 1], [], []>} : vector<8x128xf32>, vector<128x128xf32>, vector<8x128xf32> -> vector<8x128xf32>
    %c0_3 = arith.constant 0 : index
    %c0_4 = arith.constant 0 : index
    %3 = vector.load %arg3[%c0_3, %c0_4] : memref<1x128xf32, #tpu.memory_space<vmem>>, vector<1x128xf32>
    %4 = vector.broadcast %3 : vector<1x128xf32> to vector<8x128xf32>
    %5 = arith.addf %2, %4 : vector<8x128xf32>
    %6 = math.tanh %5 : vector<8x128xf32>
    %c0_5 = arith.constant 0 : index
    %c0_6 = arith.constant 0 : index
    %7 = vector.load %arg4[%c0_5, %c0_6] : memref<8x128xf32, #tpu.memory_space<vmem>>, vector<8x128xf32>
    tpu.vector_store %arg4[%c0_5, %c0_6], %6 {strides = array<i32>} : memref<8x128xf32, #tpu.memory_space<vmem>>, vector<8x128xf32>,
    %cst_7 = arith.constant dense<0.000000e+00> : vector<128xf32>
    %8 = vector.multi_reduction <add>, %6, %cst_7 [0] : vector<8x128xf32> to vector<128xf32>
    %9 = vector.shape_cast %8 : vector<128xf32> to vector<1x128xf32>
    %10 = vector.shape_cast %9 : vector<1x128xf32> to vector<1x1x128xf32>
    %c0_8 = arith.constant 0 : index
    %c0_9 = arith.constant 0 : index
    %c0_10 = arith.constant 0 : index
    %11 = vector.load %arg5[%c0_8, %c0_9, %c0_10] : memref<1x1x128xf32, #tpu.memory_space<vmem>>, vector<1x1x128xf32>
    tpu.vector_store %arg5[%c0_8, %c0_9, %c0_10], %10 {strides = array<i32>} : memref<1x1x128xf32, #tpu.memory_space<vmem>>, vector<1x1x128xf32>,
    %12 = arith.mulf %6, %6 : vector<8x128xf32>
    %cst_11 = arith.constant dense<0.000000e+00> : vector<128xf32>
    %13 = vector.multi_reduction <add>, %12, %cst_11 [0] : vector<8x128xf32> to vector<128xf32>
    %14 = vector.shape_cast %13 : vector<128xf32> to vector<1x128xf32>
    %15 = vector.shape_cast %14 : vector<1x128xf32> to vector<1x1x128xf32>
    %c0_12 = arith.constant 0 : index
    %c0_13 = arith.constant 0 : index
    %c0_14 = arith.constant 0 : index
    %16 = vector.load %arg6[%c0_12, %c0_13, %c0_14] : memref<1x1x128xf32, #tpu.memory_space<vmem>>, vector<1x1x128xf32>
    tpu.vector_store %arg6[%c0_12, %c0_13, %c0_14], %15 {strides = array<i32>} : memref<1x1x128xf32, #tpu.memory_space<vmem>>, vector<1x1x128xf32>,
    return
  }
  func.func @transform_0(%arg0: i32) -> (i32, i32) {
    %c0_i32 = arith.constant 0 : i32
    %c0_i32_0 = arith.constant 0 : i32
    return %arg0, %c0_i32 : i32, i32
  }
  func.func @transform_1(%arg0: i32) -> (i32, i32) {
    %c0_i32 = arith.constant 0 : i32
    %c0_i32_0 = arith.constant 0 : i32
    %c0_i32_1 = arith.constant 0 : i32
    return %c0_i32, %c0_i32_0 : i32, i32
  }
  func.func @transform_2(%arg0: i32) -> (i32, i32) {
    %c0_i32 = arith.constant 0 : i32
    %c0_i32_0 = arith.constant 0 : i32
    %c0_i32_1 = arith.constant 0 : i32
    return %c0_i32, %c0_i32_0 : i32, i32
  }
  func.func @transform_3(%arg0: i32) -> (i32, i32) {
    %c0_i32 = arith.constant 0 : i32
    %c0_i32_0 = arith.constant 0 : i32
    return %arg0, %c0_i32 : i32, i32
  }
  func.func @transform_4(%arg0: i32) -> (i32, i32, i32) {
    %c0_i32 = arith.constant 0 : i32
    %c0_i32_0 = arith.constant 0 : i32
    %c0_i32_1 = arith.constant 0 : i32
    return %arg0, %c0_i32, %c0_i32_0 : i32, i32, i32
  }
  func.func @transform_5(%arg0: i32) -> (i32, i32, i32) {
    %c0_i32 = arith.constant 0 : i32
    %c0_i32_0 = arith.constant 0 : i32
    %c0_i32_1 = arith.constant 0 : i32
    return %arg0, %c0_i32, %c0_i32_0 : i32, i32, i32
  }
}

module attributes {stable_mosaic.version = 11 : i64} {
  func.func @_layer_kernel(%arg0: i32, %arg1: memref<8x128xf32, #tpu.memory_space<vmem>>, %arg2: memref<128x128xf32, #tpu.memory_space<vmem>>, %arg3: memref<1x128xf32, #tpu.memory_space<vmem>>, %arg4: memref<8x128xf32, #tpu.memory_space<vmem>>) attributes {dimension_semantics = [#tpu.dimension_semantics<parallel>], iteration_bounds = array<i64: 2>, scalar_prefetch = 0 : i64, scratch_operands = 0 : i64, tpu.core_type = #tpu.core_type<tc>, window_params = [{transform_indices = @transform_0, window_bounds = array<i64: 8, 128>}, {pipeline_mode = #tpu.pipeline_mode<synchronous>, transform_indices = @transform_1, window_bounds = array<i64: 128, 128>}, {pipeline_mode = #tpu.pipeline_mode<synchronous>, transform_indices = @transform_2, window_bounds = array<i64: 1, 128>}, {transform_indices = @transform_3, window_bounds = array<i64: 8, 128>}]} {
    %c0 = arith.constant 0 : index
    %c0_0 = arith.constant 0 : index
    %0 = vector.load %arg1[%c0, %c0_0] : memref<8x128xf32, #tpu.memory_space<vmem>>, vector<8x128xf32>
    %c0_1 = arith.constant 0 : index
    %c0_2 = arith.constant 0 : index
    %1 = vector.load %arg2[%c0_1, %c0_2] : memref<128x128xf32, #tpu.memory_space<vmem>>, vector<128x128xf32>
    %cst = arith.constant dense<0.000000e+00> : vector<8x128xf32>
    %2 = tpu.matmul %0, %1, %cst {dimension_numbers = #tpu.dot_dimension_numbers<[1], [0], [0], [1], [0, 0, 1, 1], [], []>} : vector<8x128xf32>, vector<128x128xf32>, vector<8x128xf32> -> vector<8x128xf32>
    %c0_3 = arith.constant 0 : index
    %c0_4 = arith.constant 0 : index
    %3 = vector.load %arg3[%c0_3, %c0_4] : memref<1x128xf32, #tpu.memory_space<vmem>>, vector<1x128xf32>
    %4 = vector.broadcast %3 : vector<1x128xf32> to vector<8x128xf32>
    %5 = arith.addf %2, %4 : vector<8x128xf32>
    %6 = math.tanh %5 : vector<8x128xf32>
    %c0_5 = arith.constant 0 : index
    %c0_6 = arith.constant 0 : index
    %7 = vector.load %arg4[%c0_5, %c0_6] : memref<8x128xf32, #tpu.memory_space<vmem>>, vector<8x128xf32>
    tpu.vector_store %arg4[%c0_5, %c0_6], %6 {strides = array<i32>} : memref<8x128xf32, #tpu.memory_space<vmem>>, vector<8x128xf32>,
    return
  }
  func.func @transform_0(%arg0: i32) -> (i32, i32) {
    %c0_i32 = arith.constant 0 : i32
    %c0_i32_0 = arith.constant 0 : i32
    return %arg0, %c0_i32 : i32, i32
  }
  func.func @transform_1(%arg0: i32) -> (i32, i32) {
    %c0_i32 = arith.constant 0 : i32
    %c0_i32_0 = arith.constant 0 : i32
    %c0_i32_1 = arith.constant 0 : i32
    return %c0_i32, %c0_i32_0 : i32, i32
  }
  func.func @transform_2(%arg0: i32) -> (i32, i32) {
    %c0_i32 = arith.constant 0 : i32
    %c0_i32_0 = arith.constant 0 : i32
    %c0_i32_1 = arith.constant 0 : i32
    return %c0_i32, %c0_i32_0 : i32, i32
  }
  func.func @transform_3(%arg0: i32) -> (i32, i32) {
    %c0_i32 = arith.constant 0 : i32
    %c0_i32_0 = arith.constant 0 : i32
    return %arg0, %c0_i32 : i32, i32
  }
}

</mosaic_0001>

<bundles_post_ra>
// kernel: mlp3_pallas.4
= control target key start
LH: loop header
LB: loop body
LE: loop exit
PB: predicated region body
PF: predicated region fallthrough
CT: control target
= control target key end

     0   :  { %s591_s18 = smov 0   ;;  %s674_s0 = inlined_call_operand.vmem [shape: f32[16,128], index: 0, kind: input, shape index: {}]   ;;  %s675_s1 = inlined_call_operand.vmem [shape: f32[128,128], index: 1, kind: input, shape index: {}]   ;;  %s676_s2 = inlined_call_operand.vmem [shape: f32[1,128], index: 2, kind: input, shape index: {}]   ;;  %s677_s3 = inlined_call_operand.vmem [shape: f32[16,128], index: 3, kind: output, shape index: {0}]   ;;  %s678_s4 = inlined_call_operand.vmem [shape: f32[2,1,128], index: 4, kind: output, shape index: {1}]   ;;  %s679_s5 = inlined_call_operand.vmem [shape: f32[2,1,128], index: 5, kind: output, shape index: {2}]  }
   0x1 LB: > { %s451_s19 = sadd.s32 4294967295, %s556_s18   ;;  %p455_p0 = scmp.ge.s32.totalorder %s556_s18, 1  ;;  %s556_s18 = sphi %s591_s18, %s16_s18  }
   0x2   : > { %p191_p1 = scmp.lt.s32.totalorder %s556_s18, 3 }
   0x4   : > { %p192_p2 = pnand %p455_p0, %p191_p1 }
   0x5   : > { %v238_v0 = vld [vmem:[%s675_s1] sm:$0xff] (!%p192_p2)  ;;  %v239_v1 = vld [vmem:[%s675_s1 + $0x8] sm:$0xff] (!%p192_p2)  ;;  %v240_v2 = vld [vmem:[%s675_s1 + $0x10] sm:$0xff] (!%p192_p2)  ;;  %v558_v3 = vmov (!%p192_p2), 0.0|0.0   ;;  %vm559_vm0 = vmmov (!%p192_p2), 0   ;;  %v560_v6 = vmov (!%p192_p2), 0.0  }
   0x6   : > { %195 = sbr.rel (%p192_p2) target bundleno = 279 (0x117), region = 32  ;;  %513 = vmatprep.subr.bf16.mxu0 (!%p192_p2), %v558_v3  ;;  %v514_v4 = vpack.c.bf16 (!%p192_p2), %v239_v1, %v238_v0  ;;  %v241_v5 = vld [vmem:[%s675_s1 + $0x18] sm:$0xff] (!%p192_p2)  ;;  %510 = vmatprep.mubr.msk.f32.mxu0 (!%p192_p2), %vm559_vm0, %v560_v6  ;;  %v242_v8 = vld [vmem:[%s675_s1 + $0x20] sm:$0xff] (!%p192_p2)  ;;  %v243_v9 = vld [vmem:[%s675_s1 + $0x28] sm:$0xff] (!%p192_p2)  ;;  %p223_p3 = scmp.lt.s32.totalorder (!%p192_p2), %s451_s19, 1 }
   0x7   : > { %v517_v7 = vpack.c.bf16 (!%p192_p2), %v241_v5, %v240_v2  ;;  %v520_v10 = vpack.c.bf16 (!%p192_p2), %v243_v9, %v242_v8  ;;  %v244_v11 = vld [vmem:[%s675_s1 + $0x30] sm:$0xff] (!%p192_p2)  ;;  %v245_v12 = vld [vmem:[%s675_s1 + $0x38] sm:$0xff] (!%p192_p2)  ;;  %v246_v14 = vld [vmem:[%s675_s1 + $0x40] sm:$0xff] (!%p192_p2) }
   0x8   : > { %515 = vmatpush3.bf16.msra.mxu0 (!%p192_p2), %v514_v4  ;;  %v523_v13 = vpack.c.bf16 (!%p192_p2), %v245_v12, %v244_v11  ;;  %v247_v15 = vld [vmem:[%s675_s1 + $0x48] sm:$0xff] (!%p192_p2)  ;;  %v248_v17 = vld [vmem:[%s675_s1 + $0x50] sm:$0xff] (!%p192_p2)  ;;  %v249_v18 = vld [vmem:[%s675_s1 + $0x58] sm:$0xff] (!%p192_p2) }
   0x9   : > { %516 = vmatprep.subr.bf16.mxu0 (!%p192_p2), %v558_v3  ;;  %v526_v16 = vpack.c.bf16 (!%p192_p2), %v247_v15, %v246_v14  ;;  %v529_v19 = vpack.c.bf16 (!%p192_p2), %v249_v18, %v248_v17  ;;  %v250_v20 = vld [vmem:[%s675_s1 + $0x60] sm:$0xff] (!%p192_p2)  ;;  %v251_v21 = vld [vmem:[%s675_s1 + $0x68] sm:$0xff] (!%p192_p2)  ;;  %v252_v23 = vld [vmem:[%s675_s1 + $0x70] sm:$0xff] (!%p192_p2) }
   0xa   : > { %v532_v22 = vpack.c.bf16 (!%p192_p2), %v251_v21, %v250_v20  ;;  %v253_v24 = vld [vmem:[%s675_s1 + $0x78] sm:$0xff] (!%p192_p2)  ;;  %v458_v27 = vld [vmem:[%s676_s2] ss:$0 sm:$0xff] (!%p192_p2) }
   0xb   : > { %v535_v25 = vpack.c.bf16 (!%p192_p2), %v253_v24, %v252_v23 }
   0xc   : > { %518 = vmatpush3.bf16.msra.mxu0 (!%p192_p2), %v517_v7 }
   0xd   : > { %519 = vmatprep.subr.bf16.mxu0 %v558_v3  ;;  %s681_s19 = smov (!%p223_p3, %s451_s19), 1 }
   0xe   : > { %s456_s29 = sshll.u32 %s681_s19, 3  ;;  %s233_s15 = scalar_lea.vmem %s678_s4, %s681_s19 }
   0xf   : > { %s226_s7 = scalar_lea.vmem %s674_s0, %s456_s29  ;;  %s230_s12 = scalar_lea.vmem %s677_s3, %s456_s29 }
  0x10   : > { %521 = vmatpush3.bf16.msra.mxu0 %v520_v10  ;;  %v237_v26 = vld [vmem:[%s226_s7] sm:$0xff]  ;;  %s236_s20 = scalar_lea.vmem %s679_s5, %s681_s19 }
  0x11   : > { %522 = vmatprep.subr.bf16.mxu0 %v558_v3 }
  0x14   : > { %524 = vmatpush3.bf16.msra.mxu0 %v523_v13 }
  0x15   : > { %525 = vmatprep.subr.bf16.mxu0 %v558_v3 }
  0x18   : > { %527 = vmatpush3.bf16.msra.mxu0 %v526_v16 }
  0x19   : > { %528 = vmatprep.subr.bf16.mxu0 %v558_v3 }
  0x1c   : > { %530 = vmatpush3.bf16.msra.mxu0 %v529_v19 }
  0x1d   : > { %531 = vmatprep.subr.bf16.mxu0 %v558_v3 }
  0x20   : > { %533 = vmatpush3.bf16.msra.mxu0 %v532_v22 }
  0x21   : > { %534 = vmatprep.subr.bf16.mxu0 %v558_v3 }
  0x24   : > { %536 = vmatpush3.bf16.msra.mxu0 %v535_v25 }
  0x27   : > { %511 = vmatmul.mubr.f32.vlgmr.msra.gmra.mrb[0].mxu0 %v237_v26 }
  0xfa   : > { %v327_v28 = vpop.f32.mrb[0].mxu0 }
  0xfb   : > { %v328_v29 = vadd.f32 %v458_v27, %v327_v28  ;;  %v512_v30 = vpop.f32.mrb[1].mxu0 }
  0xfd   : > { %548 = vtanh.f32 %v328_v29 }
 0x107   : > { %v549_v31 = vpop.eup %548 }
 0x108   : > { %332 = vst [vmem:[%s230_s12] sm:$0xff] %v549_v31  ;;  %v333_v32 = vrot.slane %v549_v31, 4  ;;  %v340_v33 = vmul.f32 %v549_v31, %v549_v31 }
 0x10a   : > { %v334_v34 = vadd.f32 %v549_v31, %v333_v32  ;;  %v341_v35 = vrot.slane %v340_v33, 4 }
 0x10c   : > { %v335_v36 = vrot.slane %v334_v34, 2  ;;  %v342_v37 = vadd.f32 %v341_v35, %v340_v33 }
 0x10e   : > { %v336_v38 = vadd.f32 %v335_v36, %v334_v34  ;;  %v343_v39 = vrot.slane %v342_v37, 2 }
 0x110   : > { %v337_v40 = vrot.slane %v336_v38, 1  ;;  %v344_v41 = vadd.f32 %v343_v39, %v342_v37 }
 0x112   : > { %v338_v42 = vadd.f32 %v337_v40, %v336_v38  ;;  %v345_v43 = vrot.slane %v344_v41, 1 }
 0x114   : > { %339 = vst [vmem:[%s233_s15] sm:$0x1] %v338_v42  ;;  %v346_v44 = vadd.f32 %v345_v43, %v344_v41 }
 0x116   : > { %347 = vst [vmem:[%s236_s20] sm:$0x1] %v346_v44 }
 0x117 PF: > { %s16_s18 = sadd.s32 1, %s556_s18  }
 0x118   : > { %p13_p4 = scmp.ge.s32.totalorder %s16_s18, 4  }
 0x11a   :  { %15 = sbr.rel (!%p13_p4) target bundleno = 1 (0x1), region = 86 }

// kernel: mlp3_pallas.3
= control target key start
LH: loop header
LB: loop body
LE: loop exit
PB: predicated region body
PF: predicated region fallthrough
CT: control target
= control target key end

     0   :  { %11 = vsyncpa [#allocation3], 0  ;;  %s1035_s0 = inlined_call_operand.hbm [shape: f32[16,128], index: 0, kind: input, shape index: {}]   ;;  %s1036_s1 = inlined_call_operand.hbm [shape: f32[128,128], index: 1, kind: input, shape index: {}]   ;;  %s1037_s2 = inlined_call_operand.hbm [shape: f32[1,128], index: 2, kind: input, shape index: {}]   ;;  %s1038_s3 = inlined_call_operand.vmem [shape: f32[16,128], index: 3, kind: output, shape index: {0}]   ;;  %s1039_s4 = inlined_call_operand.vmem [shape: f32[2,1,128], index: 4, kind: output, shape index: {1}]   ;;  %s1040_s5 = inlined_call_operand.vmem [shape: f32[2,1,128], index: 5, kind: output, shape index: {2}]  }
   0x1   :  { %13 = vsyncpa [#allocation3 + $0x1], 0 }
   0x2   :  { %14 = vsyncpa [#allocation5], 0  ;;  %s851_s18 = smov 0   ;;  %s853_s19 = smov 0  }
   0x3   :  { %s855_s20 = smov 0   ;;  %s857_s21 = smov 0  }
   0x4 LB: > { %s870_s22 = sadd.s32 4294967295, %s811_s21   ;;  %p40_p0 = scmp.ne.s32.totalorder %s803_s19, %s799_s18  ;;  %s811_s21 = sphi %s857_s21, %s1055_s21   ;;  %s807_s20 = sphi %s855_s20, %s1054_s20   ;;  %s803_s19 = sphi %s853_s19, %s1053_s19   ;;  %s799_s18 = sphi %s851_s18, %s1052_s18  }
   0x5   : > { %p1041_p1 = scmp.eq.s32.totalorder %s870_s22, 0  ;;  %p530_p2 = scmp.ge.s32.totalorder %s811_s21, 1 }
   0x6   : > { %p171_p3 = scmp.lt.s32.totalorder %s811_s21, 3  ;;  %s813_s25 = smov [#allocation4]  }
   0x7   : > { %p878_p4 = por %p1041_p1, %p40_p0  ;;  %s183_s26 = sshll.u32 %s813_s25, 4  ;;  %s184_s26 = int_to_ptr.vmem [resolvable:$true] %s183_s26 }
   0x8   : > { %p882_p5 = pnand %p530_p2, %p171_p3  ;;  %s814_s28 = smov [#allocation6]  }
   0x9   : > { %s1044_s23 = scalar_select %p878_p4, 1, 0 }
   0xa   : > { %s1045_s24 = scalar_select %p882_p5, 1, 0 }
   0xb   : > { %p630_p6 = pneg %p882_p5  ;;  %s197_s29 = sshll.u32 %s814_s28, 4  ;;  %s894_s29 = int_to_ptr.vmem [resolvable:$true] %s197_s29 }
   0xc   : > { %s687_s7 = scalar_lea.hbm %s1036_s1, 2048 }
   0xd   : > { %p890_p7 = pnand %p630_p6, %p1041_p1  ;;  %p688_p8 = scmp.ne.s32.totalorder %s1036_s1, %s687_s7 }
   0xe   : > { %p694_p12 = scmp.lt.u32.totalorder %s687_s7, %s1036_s1 }
   0xf   : > { %p689_p9 = pneg %p890_p7 }
  0x11   : > { %p690_p10 = pnand %p689_p9, %p688_p8 }
  0x13   : > { %p691_p11 = pneg %p690_p10 }
  0x15   : > { %p696_p13 = pnand %p694_p12, %p691_p11 }
  0x17   : > { %699 = shalt.err (!%p696_p13)
}
  0x18   : > { %s700_s12 = scalar_lea.vmem %s184_s26, 2048  ;;  %p708_p6 = scmp.lt.s32.totalorder %s184_s26, %s184_s26 }
  0x19   : > { %p701_p0 = scmp.ne.s32.totalorder %s184_s26, %s700_s12  ;;  %p709_p1 = scmp.lt.s32.totalorder %s700_s12, %s700_s12 }
  0x1b   : > { %p703_p2 = pnand %p701_p0, %p689_p9  ;;  %p710_p4 = por %p709_p1, %p708_p6 }
  0x1d   : > { %p704_p3 = pneg %p703_p2 }
  0x1f   : > { %p711_p5 = pnand %p710_p4, %p704_p3 }
  0x21   : > { %714 = shalt.err (!%p711_p5)
}
  0x22   : > { %s815_s13 = smov 128   ;;  %s816_s14 = smov 8  }
  0x23   : > { %633 = dma.hbm_to_vmem [thread:$0]  (!%p890_p7), %s1036_s1, 2048, %s184_s26, [#allocation5], %s815_s13, %s815_s13, %s816_s14  }
  0x24   : > { %s715_s25 = scalar_lea.hbm %s1037_s2, 16 }
  0x25   : > { %p716_p8 = scmp.ne.s32.totalorder %s1037_s2, %s715_s25  ;;  %p722_p5 = scmp.lt.u32.totalorder %s715_s25, %s1037_s2 }
  0x27   : > { %p718_p1 = pnand %p716_p8, %p689_p9 }
  0x29   : > { %p719_p4 = pneg %p718_p1 }
  0x2b   : > { %p724_p10 = pnand %p722_p5, %p719_p4 }
  0x2d   : > { %727 = shalt.err (!%p724_p10)
}
  0x2e   : > { %s728_s26 = scalar_lea.vmem %s894_s29, 16  ;;  %s735_s8 = scalar_lea.vmem %s894_s29, 32 }
  0x2f   : > { %p729_p11 = scmp.ne.s32.totalorder %s894_s29, %s728_s26  ;;  %p736_p0 = scmp.lt.s32.totalorder %s894_s29, %s894_s29 }
  0x30   : > { %p737_p2 = scmp.lt.s32.totalorder %s735_s8, %s728_s26 }
  0x31   : > { %p731_p12 = pnand %p729_p11, %p689_p9 }
  0x32   : > { %p738_p3 = por %p737_p2, %p736_p0 }
  0x33   : > { %p732_p13 = pneg %p731_p12 }
  0x35   : > { %p739_p6 = pnand %p738_p3, %p732_p13 }
  0x37   : > { %742 = shalt.err (!%p739_p6)
}
  0x38   : > { %636 = dma.hbm_to_vmem [thread:$0]  (!%p890_p7), %s1037_s2, 16, %s894_s29, [#allocation5]  }
  0x39   : > { %s945_s11 = sadd.s32 1, %s811_s21   ;;  %s27_s12 = sadd.s32 1, %s807_s20 }
  0x3a   : > { %s24_s27 = ssub.s32 %s811_s21, %s945_s11  ;;  %p34_p9 = scmp.ne.s32.totalorder %s807_s20, %s803_s19 }
  0x3b   : > { %p25_p8 = scmp.eq.s32.totalorder %s24_s27, 0  ;;  %p35_p1 = scmp.eq.s32.totalorder %s811_s21, 0 }
  0x3c   : > { %p643_p4 = scmp.lt.s32.totalorder %s811_s21, 2  ;;  %s208_s13 = sand.u32 1, %s807_s20  }
  0x3d   : > { %s956_s14 = scalar_select %p25_p8, %s807_s20, %s27_s12  }
  0x3e   : > { %p36_p5 = por %p35_p1, %p34_p9  ;;  %s534_s15 = sshll.u32 %s208_s13, 3 }
  0x3f   : > { %s535_s16 = sshll.u32 %s811_s21, 7  ;;  %s212_s29 = scalar_lea.vmem [#allocation2], %s534_s15 }
  0x40   : > { %s962_s25 = scalar_lea.hbm %s1035_s0, %s535_s16  ;;  %s219_s28 = sshll.u32 %s212_s29, 4  ;;  %s968_s28 = int_to_ptr.vmem [resolvable:$true] %s219_s28 }
  0x41   : > { %p964_p7 = pnand %p643_p4, %p36_p5  ;;  %s209_s21 = scalar_lea.sflag [#allocation3], %s208_s13 }
  0x42   : > { %s743_s6 = scalar_lea.hbm %s962_s25, 128  ;;  %s748_s8 = scalar_lea.hbm %s1035_s0, 256 }
  0x43   : > { %p744_p10 = scmp.ne.s32.totalorder %s962_s25, %s743_s6  ;;  %p745_p11 = pneg %p964_p7 }
  0x44   : > { %p749_p0 = scmp.lt.u32.totalorder %s962_s25, %s1035_s0  ;;  %p750_p2 = scmp.lt.u32.totalorder %s748_s8, %s743_s6 }
  0x45   : > { %p746_p12 = pnand %p745_p11, %p744_p10  ;;  %p752_p6 = scmp.lt.u32.totalorder %s743_s6, %s962_s25 }
  0x46   : > { %p751_p3 = por %p750_p2, %p749_p0 }
  0x47   : > { %p747_p13 = pneg %p746_p12 }
  0x48   : > { %p753_p9 = por %p752_p6, %p751_p3 }
  0x4a   : > { %p754_p8 = pnand %p753_p9, %p747_p13 }
  0x4c   : > { %757 = shalt.err (!%p754_p8)
}
  0x4d   : > { %s758_s12 = scalar_lea.vmem %s968_s28, 128  ;;  %s817_s27 = smov [#allocation2]  }
  0x4e   : > { %p759_p1 = scmp.ne.s32.totalorder %s968_s28, %s758_s12  ;;  %s763_s13 = sshll.u32 %s817_s27, 4  ;;  %s764_s13 = int_to_ptr.vmem [resolvable:$false] %s763_s13 }
  0x4f   : > { %s765_s15 = scalar_lea.vmem %s764_s13, 256  ;;  %p766_p10 = scmp.lt.s32.totalorder %s968_s28, %s764_s13 }
  0x50   : > { %p761_p4 = pnand %p759_p1, %p745_p11  ;;  %p767_p12 = scmp.lt.s32.totalorder %s765_s15, %s758_s12 }
  0x52   : > { %p762_p5 = pneg %p761_p4  ;;  %p768_p0 = por %p767_p12, %p766_p10 }
  0x54   : > { %p769_p2 = pnand %p768_p0, %p762_p5 }
  0x56   : > { %772 = shalt.err (!%p769_p2)
}
  0x57   : > { %640 = dma.hbm_to_vmem [thread:$0]  (!%p964_p7), %s962_s25, 128, %s968_s28, %s209_s21  }
  0x58   : > { %p1048_p13 = scmp.ne.s32.totalorder %s1045_s24, 0 }
  0x59   : > { %s230_s16 = sand.u32 (!%p1048_p13), 1, %s803_s19   ;;  %p1049_p11 = scmp.ne.s32.totalorder (!%p1048_p13), %s1044_s23, 0 }
  0x5a   : > { %228 = sbr.rel (%p1048_p13) target bundleno = 375 (0x177), region = 32  ;;  %s998_s17 = sshll.u32 (!%p1048_p13), %s230_s16, 3 }
  0x5b   : > { %s231_s18 = scalar_lea.sflag (!%p1048_p13), [#allocation3], %s230_s16  ;;  %s234_s29 = scalar_lea.vmem (!%p1048_p13), [#allocation2], %s998_s17 }
  0x61   : > { %790 = dma.done.wait (%p1049_p11), %s231_s18, 128  }
  0x62   : > { %792 = vsyncadd (%p1049_p11), %s231_s18, 4294967168  ;;  %p1050_p3 = scmp.eq.s32.totalorder %s870_s22, 0 }
  0x64   : > { %794 = dma.done.wait (%p1050_p3), [#allocation5], 2064   ;;  %p1051_p7 = pmov %p1050_p3 }
  0x65   : > { %v818_v0 = vmov 0.0|0.0   ;;  %vm819_vm0 = vmmov 0   ;;  %v820_v1 = vmov 0.0   ;;  %v285_v2 = vld [vmem:[#allocation4] sm:$0xff]  ;;  %v286_v3 = vld [vmem:[#allocation4 + $0x8] sm:$0xff]  ;;  %v287_v4 = vld [vmem:[#allocation4 + $0x10] sm:$0xff] }
  0x66   : > { %796 = vsyncadd (%p1051_p7), [#allocation5], 4294965232  ;;  %596 = vmatprep.subr.bf16.mxu0 %v818_v0  ;;  %593 = vmatprep.mubr.msk.f32.mxu0 %vm819_vm0, %v820_v1  ;;  %v597_v5 = vpack.c.bf16 %v286_v3, %v285_v2  ;;  %v288_v6 = vld [vmem:[#allocation4 + $0x18] sm:$0xff]  ;;  %v289_v8 = vld [vmem:[#allocation4 + $0x20] sm:$0xff]  ;;  %p274_p6 = scmp.lt.s32.totalorder %s870_s22, 1 }
  0x67   : > { %v600_v7 = vpack.c.bf16 %v288_v6, %v287_v4  ;;  %v290_v9 = vld [vmem:[#allocation4 + $0x28] sm:$0xff]  ;;  %v291_v11 = vld [vmem:[#allocation4 + $0x30] sm:$0xff]  ;;  %v292_v12 = vld [vmem:[#allocation4 + $0x38] sm:$0xff] }
  0x68   : > { %598 = vmatpush3.bf16.msra.mxu0 %v597_v5  ;;  %v603_v10 = vpack.c.bf16 %v290_v9, %v289_v8  ;;  %v606_v13 = vpack.c.bf16 %v292_v12, %v291_v11  ;;  %v293_v14 = vld [vmem:[#allocation4 + $0x40] sm:$0xff]  ;;  %v294_v15 = vld [vmem:[#allocation4 + $0x48] sm:$0xff]  ;;  %v295_v17 = vld [vmem:[#allocation4 + $0x50] sm:$0xff]  ;;  %s1057_s22 = smov (!%p274_p6, %s870_s22), 1 }
  0x69   : > { %599 = vmatprep.subr.bf16.mxu0 %v818_v0  ;;  %v609_v16 = vpack.c.bf16 %v294_v15, %v293_v14  ;;  %v296_v18 = vld [vmem:[#allocation4 + $0x58] sm:$0xff]  ;;  %v297_v20 = vld [vmem:[#allocation4 + $0x60] sm:$0xff]  ;;  %v298_v21 = vld [vmem:[#allocation4 + $0x68] sm:$0xff]  ;;  %s540_s23 = sshll.u32 %s1057_s22, 3  ;;  %s280_s6 = scalar_lea.vmem %s1039_s4, %s1057_s22 }
  0x6a   : > { %v612_v19 = vpack.c.bf16 %v296_v18, %v295_v17  ;;  %v615_v22 = vpack.c.bf16 %v298_v21, %v297_v20  ;;  %v299_v23 = vld [vmem:[#allocation4 + $0x70] sm:$0xff]  ;;  %v300_v24 = vld [vmem:[#allocation4 + $0x78] sm:$0xff]  ;;  %v541_v27 = vld [vmem:[#allocation6] ss:$0 sm:$0xff]  ;;  %s277_s28 = scalar_lea.vmem %s1038_s3, %s540_s23  ;;  %s283_s8 = scalar_lea.vmem %s1040_s5, %s1057_s22 }
  0x6b   : > { %v618_v25 = vpack.c.bf16 %v300_v24, %v299_v23  ;;  %v284_v26 = vld [vmem:[%s234_s29] sm:$0xff] }
  0x6c   : > { %601 = vmatpush3.bf16.msra.mxu0 %v600_v7 }
  0x6d   : > { %602 = vmatprep.subr.bf16.mxu0 %v818_v0 }
  0x70   : > { %604 = vmatpush3.bf16.msra.mxu0 %v603_v10 }
  0x71   : > { %605 = vmatprep.subr.bf16.mxu0 %v818_v0 }
  0x74   : > { %607 = vmatpush3.bf16.msra.mxu0 %v606_v13 }
  0x75   : > { %608 = vmatprep.subr.bf16.mxu0 %v818_v0 }
  0x78   : > { %610 = vmatpush3.bf16.msra.mxu0 %v609_v16 }
  0x79   : > { %611 = vmatprep.subr.bf16.mxu0 %v818_v0 }
  0x7c   : > { %613 = vmatpush3.bf16.msra.mxu0 %v612_v19 }
  0x7d   : > { %614 = vmatprep.subr.bf16.mxu0 %v818_v0 }
  0x80   : > { %616 = vmatpush3.bf16.msra.mxu0 %v615_v22 }
  0x81   : > { %617 = vmatprep.subr.bf16.mxu0 %v818_v0 }
  0x84   : > { %619 = vmatpush3.bf16.msra.mxu0 %v618_v25 }
  0x87   : > { %594 = vmatmul.mubr.f32.vlgmr.msra.gmra.mrb[0].mxu0 %v284_v26 }
 0x15a   : > { %v374_v28 = vpop.f32.mrb[0].mxu0 }
 0x15b   : > { %v375_v29 = vadd.f32 %v541_v27, %v374_v28  ;;  %v595_v30 = vpop.f32.mrb[1].mxu0 }
 0x15d   : > { %685 = vtanh.f32 %v375_v29 }
 0x167   : > { %v686_v31 = vpop.eup %685 }
 0x168   : > { %379 = vst [vmem:[%s277_s28] sm:$0xff] %v686_v31  ;;  %v380_v32 = vrot.slane %v686_v31, 4  ;;  %v387_v33 = vmul.f32 %v686_v31, %v686_v31 }
 0x16a   : > { %v381_v34 = vadd.f32 %v686_v31, %v380_v32  ;;  %v388_v35 = vrot.slane %v387_v33, 4 }
 0x16c   : > { %v382_v36 = vrot.slane %v381_v34, 2  ;;  %v389_v37 = vadd.f32 %v388_v35, %v387_v33 }
 0x16e   : > { %v383_v38 = vadd.f32 %v382_v36, %v381_v34  ;;  %v390_v39 = vrot.slane %v389_v37, 2 }
 0x170   : > { %v384_v40 = vrot.slane %v383_v38, 1  ;;  %v391_v41 = vadd.f32 %v390_v39, %v389_v37 }
 0x172   : > { %v385_v42 = vadd.f32 %v384_v40, %v383_v38  ;;  %v392_v43 = vrot.slane %v391_v41, 1 }
 0x174   : > { %386 = vst [vmem:[%s280_s6] sm:$0x1] %v385_v42  ;;  %v393_v44 = vadd.f32 %v392_v43, %v391_v41 }
 0x176   : > { %394 = vst [vmem:[%s283_s8] sm:$0x1] %v393_v44 }
 0x177 PF: > { %p17_p9 = scmp.ge.s32.totalorder %s945_s11, 4   ;;  %s1052_s18 = smov %s803_s19 }
 0x178   : > { %s1053_s19 = smov %s807_s20  ;;  %s1054_s20 = smov %s956_s14 }
 0x179   : > { %s1055_s21 = smov %s945_s11  ;;  %19 = sbr.rel (!%p17_p9) target bundleno = 4 (0x4), region = 104 }
 0x180   :  { %438 = vsyncpa [#allocation3], 1 }
 0x181   :  { %440 = vsyncpa [#allocation3 + $0x1], 1 }
 0x182   :  { %441 = vsyncpa [#allocation5], 1 }

// kernel: mlp3_pallas.5
= control target key start
LH: loop header
LB: loop body
LE: loop exit
PB: predicated region body
PF: predicated region fallthrough
CT: control target
= control target key end

     0   :  { %8 = vsyncpa [#allocation3], 0  ;;  %s705_s0 = inlined_call_operand.vmem [shape: f32[16,128], index: 0, kind: input, shape index: {}]   ;;  %s706_s1 = inlined_call_operand.vmem [shape: f32[128,128], index: 1, kind: input, shape index: {}]   ;;  %s707_s2 = inlined_call_operand.vmem [shape: f32[1,128], index: 2, kind: input, shape index: {}]   ;;  %s708_s3 = inlined_call_operand.hbm [shape: f32[16,128], index: 3, kind: output, shape index: {}]  }
   0x1   :  { %10 = vsyncpa [#allocation3 + $0x1], 0  ;;  %s554_s12 = smov 0   ;;  %s556_s13 = smov 0  }
   0x2   :  { %s558_s14 = smov 0   ;;  %s560_s15 = smov 0  }
   0x3 LB: > { %s575_s16 = sadd.s32 4294967295, %s528_s15   ;;  %s335_s17 = sadd.s32 4294967294, %s528_s15   ;;  %s528_s15 = sphi %s560_s15, %s714_s15   ;;  %s524_s14 = sphi %s558_s14, %s713_s14   ;;  %s520_s13 = sphi %s556_s13, %s712_s13   ;;  %s516_s12 = sphi %s554_s12, %s711_s12  }
   0x4   : > { %s579_s18 = sadd.s32 1, %s528_s15   ;;  %s91_s19 = sadd.s32 1, %s524_s14 }
   0x5   : > { %s88_s20 = ssub.s32 %s528_s15, %s579_s18  ;;  %p101_p0 = scmp.ne.s32.totalorder %s524_s14, %s520_s13 }
   0x6   : > { %p89_p1 = scmp.eq.s32.totalorder %s88_s20, 0  ;;  %p102_p2 = scmp.eq.s32.totalorder %s575_s16, 1 }
   0x7   : > { %p107_p3 = scmp.ne.s32.totalorder %s520_s13, %s516_s12  ;;  %p108_p4 = scmp.eq.s32.totalorder %s335_s17, 1 }
   0x8   : > { %s590_s21 = scalar_select %p89_p1, %s524_s14, %s91_s19  }
   0x9   : > { %p592_p5 = por %p102_p2, %p101_p0  ;;  %p596_p6 = por %p108_p4, %p107_p3 }
   0xa   : > { %p338_p7 = scmp.ge.s32.totalorder %s528_s15, 1  ;;  %p139_p8 = scmp.lt.s32.totalorder %s528_s15, 3 }
   0xc   : > { %p140_p9 = pnand %p338_p7, %p139_p8 }
   0xd   : > { %v167_v0 = vld [vmem:[%s706_s1] sm:$0xff] (!%p140_p9)  ;;  %v168_v1 = vld [vmem:[%s706_s1 + $0x8] sm:$0xff] (!%p140_p9)  ;;  %v169_v2 = vld [vmem:[%s706_s1 + $0x10] sm:$0xff] (!%p140_p9)  ;;  %v530_v3 = vmov (!%p140_p9), 0.0|0.0   ;;  %vm531_vm0 = vmmov (!%p140_p9), 0   ;;  %v532_v6 = vmov (!%p140_p9), 0.0  }
   0xe   : > { %143 = sbr.rel (%p140_p9) target bundleno = 286 (0x11e), region = 32  ;;  %398 = vmatprep.subr.bf16.mxu0 (!%p140_p9), %v530_v3  ;;  %v399_v4 = vpack.c.bf16 (!%p140_p9), %v168_v1, %v167_v0  ;;  %v170_v5 = vld [vmem:[%s706_s1 + $0x18] sm:$0xff] (!%p140_p9)  ;;  %395 = vmatprep.mubr.msk.f32.mxu0 (!%p140_p9), %vm531_vm0, %v532_v6  ;;  %v171_v8 = vld [vmem:[%s706_s1 + $0x20] sm:$0xff] (!%p140_p9)  ;;  %v172_v9 = vld [vmem:[%s706_s1 + $0x28] sm:$0xff] (!%p140_p9)  ;;  %p162_p10 = scmp.lt.s32.totalorder (!%p140_p9), %s575_s16, 1 }
   0xf   : > { %v402_v7 = vpack.c.bf16 (!%p140_p9), %v170_v5, %v169_v2  ;;  %v405_v10 = vpack.c.bf16 (!%p140_p9), %v172_v9, %v171_v8  ;;  %v173_v11 = vld [vmem:[%s706_s1 + $0x30] sm:$0xff] (!%p140_p9)  ;;  %v174_v12 = vld [vmem:[%s706_s1 + $0x38] sm:$0xff] (!%p140_p9)  ;;  %v175_v14 = vld [vmem:[%s706_s1 + $0x40] sm:$0xff] (!%p140_p9)  ;;  %s159_s27 = sand.u32 (!%p140_p9), 1, %s520_s13   ;;  %s343_s29 = sshll.u32 (!%p140_p9), %s575_s16, 7 }
  0x10   : > { %400 = vmatpush3.bf16.msra.mxu0 (!%p140_p9), %v399_v4  ;;  %v408_v13 = vpack.c.bf16 (!%p140_p9), %v174_v12, %v173_v11  ;;  %v176_v15 = vld [vmem:[%s706_s1 + $0x48] sm:$0xff] (!%p140_p9)  ;;  %v177_v17 = vld [vmem:[%s706_s1 + $0x50] sm:$0xff] (!%p140_p9)  ;;  %v178_v18 = vld [vmem:[%s706_s1 + $0x58] sm:$0xff] (!%p140_p9)  ;;  %s339_s28 = sshll.u32 (!%p140_p9), %s159_s27, 3  ;;  %s263_s8 = scalar_lea.sflag (!%p140_p9), [#allocation3], %s159_s27 }
  0x11   : > { %401 = vmatprep.subr.bf16.mxu0 (!%p140_p9), %v530_v3  ;;  %v411_v16 = vpack.c.bf16 (!%p140_p9), %v176_v15, %v175_v14  ;;  %v414_v19 = vpack.c.bf16 (!%p140_p9), %v178_v18, %v177_v17  ;;  %v179_v20 = vld [vmem:[%s706_s1 + $0x60] sm:$0xff] (!%p140_p9)  ;;  %v180_v21 = vld [vmem:[%s706_s1 + $0x68] sm:$0xff] (!%p140_p9)  ;;  %v181_v23 = vld [vmem:[%s706_s1 + $0x70] sm:$0xff] (!%p140_p9)  ;;  %s161_s30 = scalar_lea.vmem (!%p140_p9), [#allocation2], %s339_s28 }
  0x12   : > { %v417_v22 = vpack.c.bf16 (!%p140_p9), %v180_v21, %v179_v20  ;;  %v182_v24 = vld [vmem:[%s706_s1 + $0x78] sm:$0xff] (!%p140_p9)  ;;  %v341_v27 = vld [vmem:[%s707_s2] ss:$0 sm:$0xff] (!%p140_p9)  ;;  %s276_s4 = sshll.u32 (!%p140_p9), %s161_s30, 4  ;;  %s665_s4 = int_to_ptr.vmem [resolvable:$true] %s276_s4 }
  0x13   : > { %v420_v25 = vpack.c.bf16 (!%p140_p9), %v182_v24, %v181_v23  ;;  %s466_s9 = scalar_lea.vmem (!%p140_p9), %s665_s4, 128 }
  0x14   : > { %403 = vmatpush3.bf16.msra.mxu0 (!%p140_p9), %v402_v7  ;;  %p467_p11 = scmp.ne.s32.totalorder (!%p140_p9), %s665_s4, %s466_s9 }
  0x15   : > { %404 = vmatprep.subr.bf16.mxu0 %v530_v3  ;;  %s163_s7 = scalar_select %p162_p10, %s575_s16, 1 }
  0x16   : > { %p468_p12 = pnand %p467_p11, %p592_p5  ;;  %s533_s16 = smov [#allocation2]  }
  0x17   : > { %s340_s17 = sshll.u32 %s163_s7, 3  ;;  %s663_s7 = scalar_lea.hbm %s708_s3, %s343_s29 }
  0x18   : > { %406 = vmatpush3.bf16.msra.mxu0 %v405_v10  ;;  %s165_s24 = scalar_lea.vmem %s705_s0, %s340_s17  ;;  %p469_p13 = pneg %p468_p12 }
  0x19   : > { %407 = vmatprep.subr.bf16.mxu0 %v530_v3  ;;  %v166_v26 = vld [vmem:[%s165_s24] sm:$0xff]  ;;  %s470_s10 = sshll.u32 %s533_s16, 4  ;;  %s471_s10 = int_to_ptr.vmem [resolvable:$false] %s470_s10 }
  0x1a   : > { %s472_s11 = scalar_lea.vmem %s471_s10, 256  ;;  %p473_p0 = scmp.lt.s32.totalorder %s665_s4, %s471_s10 }
  0x1b   : > { %p474_p1 = scmp.lt.s32.totalorder %s472_s11, %s466_s9 }
  0x1c   : > { %409 = vmatpush3.bf16.msra.mxu0 %v408_v13 }
  0x1d   : > { %410 = vmatprep.subr.bf16.mxu0 %v530_v3  ;;  %p475_p2 = por %p474_p1, %p473_p0 }
  0x1f   : > { %p476_p3 = pnand %p475_p2, %p469_p13 }
  0x20   : > { %412 = vmatpush3.bf16.msra.mxu0 %v411_v16 }
  0x21   : > { %413 = vmatprep.subr.bf16.mxu0 %v530_v3 }
  0x24   : > { %415 = vmatpush3.bf16.msra.mxu0 %v414_v19 }
  0x25   : > { %416 = vmatprep.subr.bf16.mxu0 %v530_v3 }
  0x28   : > { %418 = vmatpush3.bf16.msra.mxu0 %v417_v22 }
  0x29   : > { %419 = vmatprep.subr.bf16.mxu0 %v530_v3 }
  0x2c   : > { %421 = vmatpush3.bf16.msra.mxu0 %v420_v25 }
  0x2f   : > { %396 = vmatmul.mubr.f32.vlgmr.msra.gmra.mrb[0].mxu0 %v166_v26 }
 0x102   : > { %v256_v28 = vpop.f32.mrb[0].mxu0 }
 0x103   : > { %v257_v29 = vadd.f32 %v341_v27, %v256_v28  ;;  %v397_v30 = vpop.f32.mrb[1].mxu0 }
 0x105   : > { %464 = vtanh.f32 %v257_v29 }
 0x10f   : > { %v465_v31 = vpop.eup %464 }
 0x110   : > { %261 = vst [vmem:[%s161_s30] sm:$0xff] %v465_v31 }
 0x111   : > { %479 = shalt.err (!%p476_p3)
}
 0x112   : > { %s480_s17 = scalar_lea.hbm %s663_s7, 128  ;;  %s484_s24 = scalar_lea.hbm %s708_s3, 256 }
 0x113   : > { %p481_p4 = scmp.ne.s32.totalorder %s663_s7, %s480_s17  ;;  %p485_p9 = scmp.lt.u32.totalorder %s663_s7, %s708_s3 }
 0x114   : > { %p486_p10 = scmp.lt.u32.totalorder %s484_s24, %s480_s17  ;;  %p488_p12 = scmp.lt.u32.totalorder %s480_s17, %s663_s7 }
 0x115   : > { %p482_p7 = pnand %p481_p4, %p592_p5 }
 0x116   : > { %p487_p11 = por %p486_p10, %p485_p9 }
 0x117   : > { %p483_p8 = pneg %p482_p7 }
 0x118   : > { %p489_p13 = por %p488_p12, %p487_p11 }
 0x11a   : > { %p490_p0 = pnand %p489_p13, %p483_p8 }
 0x11c   : > { %493 = shalt.err (!%p490_p0)
}
 0x11d   : > { %422 = dma.vmem_to_hbm [thread:$0]  (%p592_p5), %s665_s4, 128, %s663_s7, %s263_s8  }
 0x11e PF: > { %p428_p1 = scmp.ge.s32.totalorder %s528_s15, 2  ;;  %s288_s27 = sand.u32 1, %s516_s12  }
 0x11f   : > { %s289_s28 = scalar_lea.sflag [#allocation3], %s288_s27 }
 0x120   : > { %p425_p2 = pnand %p428_p1, %p596_p6 }
 0x122   : > { %511 = dma.done.wait (!%p425_p2), %s289_s28, 128  }
 0x123   : > { %513 = vsyncadd (!%p425_p2), %s289_s28, 4294967168  ;;  %p13_p3 = scmp.ge.s32.totalorder %s579_s18, 4   ;;  %s711_s12 = smov %s520_s13 }
 0x124   : > { %s712_s13 = smov %s524_s14  ;;  %s713_s14 = smov %s590_s21 }
 0x125   : > { %s714_s15 = smov %s579_s18  ;;  %15 = sbr.rel (!%p13_p3) target bundleno = 3 (0x3), region = 67 }
 0x12c   :  { %294 = vsyncpa [#allocation3], 1 }
 0x12d   :  { %296 = vsyncpa [#allocation3 + $0x1], 1 }

</bundles_post_ra>
